<compile_context>
chip_gen: v6e
topology: v6e:2x2x1
jax: 0.10.0
libtpu: 0.0.40
codegen_flags: <defaults>
</compile_context>

<pallas_src>
import jax
import jax.numpy as jnp
from jax import lax
from jax.experimental import pallas as pl
from jax.experimental.pallas import tpu as pltpu


def _embed_kernel(idx_ref, table_t_ref, out_ref):
    # idx_ref:     (BT_TILE, 1, HW_TILE) int32  lane-dense category indices
    # table_t_ref: (E, C_PAD)            f32    transposed, zero-padded embedding table
    # out_ref:     (BT_TILE, E, HW_TILE) f32    embedded vectors, already in final layout
    c_pad = table_t_ref.shape[1]
    bt_tile, _, hw_tile = idx_ref.shape

    table_t = table_t_ref[...]                                  # (E, C_PAD), load once

    # Hoisted above the BT loop: one sublane-iota reused for every row in the block.
    iota = lax.broadcasted_iota(jnp.int32, (c_pad, hw_tile), 0)

    def body(b, carry):
        idx_row = idx_ref[b]                                    # (1, HW_TILE)
        # One-hot over the (sublane) category axis; padded category rows never match.
        onehot = (iota == idx_row).astype(table_t.dtype)        # (C_PAD, HW_TILE)
        # (E, C_PAD) @ (C_PAD, HW_TILE) -> (E, HW_TILE): MXU does the gather; the
        # result is lane-dense so the store path is unmasked full-width vst.
        out_ref[b] = jnp.dot(
            table_t, onehot, preferred_element_type=jnp.float32
        ).astype(out_ref.dtype)
        return carry

    lax.fori_loop(0, bt_tile, body, None, unroll=True)


def categorical_embedding(x, table, *, hw_tile_cap=8192, bt_tile_cap=4):
    """x: (B, T, H, W) integer tensor; table: (C, E) float32 embedding table.

    Returns (B, T, E, H, W) float32, matching the PyTorch module's forward.
    """
    B, T, H, W = x.shape
    C, E = table.shape
    BT = B * T
    HW = H * W

    # Lane (HW) tiling: split HW into ~equal tiles (multiple of 128) of at most
    # hw_tile_cap, then pad HW up to a multiple of the chosen tile.
    n_hw_tiles = pl.cdiv(HW, hw_tile_cap)
    hw_tile = ((pl.cdiv(HW, n_hw_tiles) + 127) // 128) * 128
    HWp = n_hw_tiles * hw_tile
    grid_hw = HWp // hw_tile

    # BT tiling: batch rows per grid step to amortize per-step overhead, but keep
    # at least 2 parallel grid steps when possible (v7x has 2 TensorCores/chip).
    bt_tile = min(bt_tile_cap, BT)
    if grid_hw == 1 and BT >= 2:
        bt_tile = min(bt_tile, max(1, BT // 2))
    BTp = pl.cdiv(BT, bt_tile) * bt_tile
    grid_bt = BTp // bt_tile

    # Lane-dense index view: (BT, 1, HW).  Pad BT / HW only if needed; padded rows
    # and lanes are sliced off after the kernel.
    idx = x.reshape(BT, 1, HW).astype(jnp.int32)
    if HWp != HW or BTp != BT:
        idx = jnp.pad(idx, ((0, BTp - BT), (0, 0), (0, HWp - HW)))

    # Category axis: zero-pad only up to the sublane quantum (8).  The MXU pads the
    # contraction to native depth internally, so a deeper one-hot buys nothing; the
    # padded category rows are never selected.
    c_pad = ((max(C, 8) + 7) // 8) * 8
    table_t = jnp.zeros((E, c_pad), table.dtype).at[:, :C].set(table.T)

    out = pl.pallas_call(
        _embed_kernel,
        out_shape=jax.ShapeDtypeStruct((BTp, E, HWp), jnp.float32),
        grid_spec=pltpu.PrefetchScalarGridSpec(
            num_scalar_prefetch=0,
            grid=(grid_bt, grid_hw),
            in_specs=[
                pl.BlockSpec((bt_tile, 1, hw_tile), lambda i, j: (i, 0, j)),  # indices
                pl.BlockSpec((E, c_pad), lambda i, j: (0, 0)),                # table^T (resident)
            ],
            out_specs=pl.BlockSpec((bt_tile, E, hw_tile), lambda i, j: (i, 0, j)),
        ),
        compiler_params=pltpu.CompilerParams(
            dimension_semantics=("parallel", "parallel"),
            vmem_limit_bytes=32 * 1024 * 1024,  # fits double-buffered tiles on v5e/v6e/v7x
        ),
        cost_estimate=pl.CostEstimate(
            flops=2 * BTp * HWp * c_pad * E,
            transcendentals=0,
            bytes_accessed=BTp * HWp * 4 + E * c_pad * 4 + BTp * E * HWp * 4,
        ),
    )(idx, table_t)

    if HWp != HW or BTp != BT:
        out = out[:BT, :, :HW]
    # (BT, E, HW) -> (B, T, E, H, W): pure reshape, no transpose needed.
    return out.reshape(B, T, E, H, W)


if __name__ == "__main__":
    # Module hyperparameters (deterministic, in-script "init").
    category_size = 16
    embedding_dim = 32

    key = jax.random.PRNGKey(0)
    k_table, k_idx = jax.random.split(key)

    # nn.Embedding init: N(0, 1) weights, with padding_idx=0 row zeroed.
    table = jax.random.normal(k_table, (category_size, embedding_dim), jnp.float32)
    table = table.at[0].set(0.0)

    # Input: (B, T, H, W) categorical indices in [0, category_size).
    B, T, H, W = 2, 4, 16, 16
    x = jax.random.randint(k_idx, (B, T, H, W), 0, category_size, dtype=jnp.int32)

    out = categorical_embedding(x, table)
    out = jax.block_until_ready(out)

    # Reference check (pure JAX gather + permute, same semantics as the PyTorch module).
    ref = jnp.take(table, x.reshape(-1), axis=0).reshape(B, T, H, W, embedding_dim)
    ref = jnp.transpose(ref, (0, 1, 4, 2, 3))

    assert out.shape == (B, T, embedding_dim, H, W), out.shape
    assert jnp.allclose(out, ref, atol=1e-5, rtol=1e-5), "mismatch vs reference"

    print("KERNEL_OK")
</pallas_src>

<mosaic_0001>
module attributes {stable_mosaic.version = 11 : i64} {
  func.func @_embed_kernel(%arg0: i32, %arg1: i32, %arg2: memref<4x1x256xi32, #tpu.memory_space<vmem>>, %arg3: memref<32x16xf32, #tpu.memory_space<vmem>>, %arg4: memref<4x32x256xf32, #tpu.memory_space<vmem>>) attributes {dimension_semantics = [#tpu.dimension_semantics<parallel>, #tpu.dimension_semantics<parallel>], iteration_bounds = array<i64: 2, 1>, scalar_prefetch = 0 : i64, scratch_operands = 0 : i64, tpu.core_type = #tpu.core_type<tc>, window_params = [{transform_indices = @transform_0, window_bounds = array<i64: 4, 1, 256>}, {pipeline_mode = #tpu.pipeline_mode<synchronous>, transform_indices = @transform_1, window_bounds = array<i64: 32, 16>}, {transform_indices = @transform_2, window_bounds = array<i64: 4, 32, 256>}]} {
    %c0 = arith.constant 0 : index
    %c0_0 = arith.constant 0 : index
    %0 = vector.load %arg3[%c0, %c0_0] : memref<32x16xf32, #tpu.memory_space<vmem>>, vector<32x16xf32>
    %1 = tpu.iota {dimensions = array<i32: 0>} : vector<16x256xi32>
    %c0_i32 = arith.constant 0 : i32
    %2 = arith.index_cast %c0_i32 : i32 to index
    %c0_1 = arith.constant 0 : index
    %c0_2 = arith.constant 0 : index
    %3 = vector.load %arg2[%2, %c0_1, %c0_2] : memref<4x1x256xi32, #tpu.memory_space<vmem>>, vector<1x1x256xi32>
    %4 = vector.shape_cast %3 : vector<1x1x256xi32> to vector<1x256xi32>
    %5 = vector.broadcast %4 : vector<1x256xi32> to vector<16x256xi32>
    %6 = arith.cmpi eq, %1, %5 : vector<16x256xi32>
    %7 = arith.extui %6 : vector<16x256xi1> to vector<16x256xi32>
    %8 = arith.sitofp %7 : vector<16x256xi32> to vector<16x256xf32>
    %cst = arith.constant dense<0.000000e+00> : vector<32x256xf32>
    %9 = tpu.matmul %0, %8, %cst {dimension_numbers = #tpu.dot_dimension_numbers<[1], [0], [0], [1], [0, 0, 1, 1], [], []>} : vector<32x16xf32>, vector<16x256xf32>, vector<32x256xf32> -> vector<32x256xf32>
    %10 = arith.index_cast %c0_i32 : i32 to index
    %c0_3 = arith.constant 0 : index
    %c0_4 = arith.constant 0 : index
    %11 = vector.load %arg4[%10, %c0_3, %c0_4] : memref<4x32x256xf32, #tpu.memory_space<vmem>>, vector<1x32x256xf32>
    %12 = vector.shape_cast %11 : vector<1x32x256xf32> to vector<32x256xf32>
    %13 = vector.shape_cast %9 : vector<32x256xf32> to vector<1x32x256xf32>
    tpu.vector_store %arg4[%10, %c0_3, %c0_4], %13 {strides = array<i32>} : memref<4x32x256xf32, #tpu.memory_space<vmem>>, vector<1x32x256xf32>,
    %c1_i32 = arith.constant 1 : i32
    %14 = arith.index_cast %c1_i32 : i32 to index
    %c0_5 = arith.constant 0 : index
    %c0_6 = arith.constant 0 : index
    %15 = vector.load %arg2[%14, %c0_5, %c0_6] : memref<4x1x256xi32, #tpu.memory_space<vmem>>, vector<1x1x256xi32>
    %16 = vector.shape_cast %15 : vector<1x1x256xi32> to vector<1x256xi32>
    %17 = vector.broadcast %16 : vector<1x256xi32> to vector<16x256xi32>
    %18 = arith.cmpi eq, %1, %17 : vector<16x256xi32>
    %19 = arith.extui %18 : vector<16x256xi1> to vector<16x256xi32>
    %20 = arith.sitofp %19 : vector<16x256xi32> to vector<16x256xf32>
    %cst_7 = arith.constant dense<0.000000e+00> : vector<32x256xf32>
    %21 = tpu.matmul %0, %20, %cst_7 {dimension_numbers = #tpu.dot_dimension_numbers<[1], [0], [0], [1], [0, 0, 1, 1], [], []>} : vector<32x16xf32>, vector<16x256xf32>, vector<32x256xf32> -> vector<32x256xf32>
    %22 = arith.index_cast %c1_i32 : i32 to index
    %c0_8 = arith.constant 0 : index
    %c0_9 = arith.constant 0 : index
    %23 = vector.load %arg4[%22, %c0_8, %c0_9] : memref<4x32x256xf32, #tpu.memory_space<vmem>>, vector<1x32x256xf32>
    %24 = vector.shape_cast %23 : vector<1x32x256xf32> to vector<32x256xf32>
    %25 = vector.shape_cast %21 : vector<32x256xf32> to vector<1x32x256xf32>
    tpu.vector_store %arg4[%22, %c0_8, %c0_9], %25 {strides = array<i32>} : memref<4x32x256xf32, #tpu.memory_space<vmem>>, vector<1x32x256xf32>,
    %c2_i32 = arith.constant 2 : i32
    %26 = arith.index_cast %c2_i32 : i32 to index
    %c0_10 = arith.constant 0 : index
    %c0_11 = arith.constant 0 : index
    %27 = vector.load %arg2[%26, %c0_10, %c0_11] : memref<4x1x256xi32, #tpu.memory_space<vmem>>, vector<1x1x256xi32>
    %28 = vector.shape_cast %27 : vector<1x1x256xi32> to vector<1x256xi32>
    %29 = vector.broadcast %28 : vector<1x256xi32> to vector<16x256xi32>
    %30 = arith.cmpi eq, %1, %29 : vector<16x256xi32>
    %31 = arith.extui %30 : vector<16x256xi1> to vector<16x256xi32>
    %32 = arith.sitofp %31 : vector<16x256xi32> to vector<16x256xf32>
    %cst_12 = arith.constant dense<0.000000e+00> : vector<32x256xf32>
    %33 = tpu.matmul %0, %32, %cst_12 {dimension_numbers = #tpu.dot_dimension_numbers<[1], [0], [0], [1], [0, 0, 1, 1], [], []>} : vector<32x16xf32>, vector<16x256xf32>, vector<32x256xf32> -> vector<32x256xf32>
    %34 = arith.index_cast %c2_i32 : i32 to index
    %c0_13 = arith.constant 0 : index
    %c0_14 = arith.constant 0 : index
    %35 = vector.load %arg4[%34, %c0_13, %c0_14] : memref<4x32x256xf32, #tpu.memory_space<vmem>>, vector<1x32x256xf32>
    %36 = vector.shape_cast %35 : vector<1x32x256xf32> to vector<32x256xf32>
    %37 = vector.shape_cast %33 : vector<32x256xf32> to vector<1x32x256xf32>
    tpu.vector_store %arg4[%34, %c0_13, %c0_14], %37 {strides = array<i32>} : memref<4x32x256xf32, #tpu.memory_space<vmem>>, vector<1x32x256xf32>,
    %c3_i32 = arith.constant 3 : i32
    %38 = arith.index_cast %c3_i32 : i32 to index
    %c0_15 = arith.constant 0 : index
    %c0_16 = arith.constant 0 : index
    %39 = vector.load %arg2[%38, %c0_15, %c0_16] : memref<4x1x256xi32, #tpu.memory_space<vmem>>, vector<1x1x256xi32>
    %40 = vector.shape_cast %39 : vector<1x1x256xi32> to vector<1x256xi32>
    %41 = vector.broadcast %40 : vector<1x256xi32> to vector<16x256xi32>
    %42 = arith.cmpi eq, %1, %41 : vector<16x256xi32>
    %43 = arith.extui %42 : vector<16x256xi1> to vector<16x256xi32>
    %44 = arith.sitofp %43 : vector<16x256xi32> to vector<16x256xf32>
    %cst_17 = arith.constant dense<0.000000e+00> : vector<32x256xf32>
    %45 = tpu.matmul %0, %44, %cst_17 {dimension_numbers = #tpu.dot_dimension_numbers<[1], [0], [0], [1], [0, 0, 1, 1], [], []>} : vector<32x16xf32>, vector<16x256xf32>, vector<32x256xf32> -> vector<32x256xf32>
    %46 = arith.index_cast %c3_i32 : i32 to index
    %c0_18 = arith.constant 0 : index
    %c0_19 = arith.constant 0 : index
    %47 = vector.load %arg4[%46, %c0_18, %c0_19] : memref<4x32x256xf32, #tpu.memory_space<vmem>>, vector<1x32x256xf32>
    %48 = vector.shape_cast %47 : vector<1x32x256xf32> to vector<32x256xf32>
    %49 = vector.shape_cast %45 : vector<32x256xf32> to vector<1x32x256xf32>
    tpu.vector_store %arg4[%46, %c0_18, %c0_19], %49 {strides = array<i32>} : memref<4x32x256xf32, #tpu.memory_space<vmem>>, vector<1x32x256xf32>,
    %c4_i32 = arith.constant 4 : i32
    return
  }
  func.func @transform_0(%arg0: i32, %arg1: i32) -> (i32, i32, i32) {
    %c0_i32 = arith.constant 0 : i32
    %c0_i32_0 = arith.constant 0 : i32
    return %arg0, %c0_i32, %arg1 : i32, i32, i32
  }
  func.func @transform_1(%arg0: i32, %arg1: i32) -> (i32, i32) {
    %c0_i32 = arith.constant 0 : i32
    %c0_i32_0 = arith.constant 0 : i32
    %c0_i32_1 = arith.constant 0 : i32
    return %c0_i32, %c0_i32_0 : i32, i32
  }
  func.func @transform_2(%arg0: i32, %arg1: i32) -> (i32, i32, i32) {
    %c0_i32 = arith.constant 0 : i32
    %c0_i32_0 = arith.constant 0 : i32
    return %arg0, %c0_i32, %arg1 : i32, i32, i32
  }
}

</mosaic_0001>

<bundles_post_ra>
// kernel: tpu_custom_call.1
= control target key start
LH: loop header
LB: loop body
LE: loop exit
PB: predicated region body
PF: predicated region fallthrough
CT: control target
= control target key end

     0   :  { %7 = vsyncpa [#allocation3], 0  ;;  %s1224_s0 = inlined_call_operand.vmem [shape: s32[8,1,256], index: 0, kind: input, shape index: {}]   ;;  %s1225_s1 = inlined_call_operand.vmem [shape: f32[32,16], index: 1, kind: input, shape index: {}]   ;;  %s1226_s2 = inlined_call_operand.hbm [shape: f32[8,32,256], index: 2, kind: output, shape index: {}]  }
   0x1   :  { %9 = vsyncpa [#allocation3 + $0x1], 0  ;;  %s1015_s9 = smov 0   ;;  %s1017_s10 = smov 0  }
   0x2   :  { %s1019_s11 = smov 0   ;;  %s1021_s12 = smov 0  }
   0x3   :  { %s1023_s13 = smov 0   ;;  %s1025_s14 = smov 0  }
   0x4 LB: > { %s767_s15 = sadd.s32 4294967295, %s993_s14   ;;  %s768_s16 = sadd.s32 4294967294, %s993_s14   ;;  %s993_s14 = sphi %s1025_s14, %s15_s14   ;;  %s989_s13 = sphi %s1023_s13, %s1233_s13   ;;  %s985_s12 = sphi %s1021_s12, %s1232_s12   ;;  %s981_s11 = sphi %s1019_s11, %s1231_s11   ;;  %s977_s10 = sphi %s1017_s10, %s1230_s10   ;;  %s973_s9 = sphi %s1015_s9, %s1229_s9  }
   0x5   : > { %s27_s17 = sadd.s32 1, %s989_s13  ;;  %s85_s18 = sadd.s32 1, %s981_s11 }
   0x6   : > { %p29_p0 = scmp.ge.s32.totalorder %s27_s17, 2  ;;  %p95_p1 = scmp.ne.s32.totalorder %s981_s11, %s977_s10 }
   0x7   : > { %p96_p2 = scmp.eq.s32.totalorder %s767_s15, 1  ;;  %p101_p3 = scmp.ne.s32.totalorder %s977_s10, %s973_s9 }
   0x8   : > { %s1235_s17 = smov (%p29_p0, %s27_s17), 0  ;;  %p102_p5 = scmp.eq.s32.totalorder %s768_s16, 1 }
   0x9   : > { %p1055_p4 = por %p96_p2, %p95_p1  ;;  %s80_s20 = ssub.s32 %s989_s13, %s1235_s17 }
   0xa   : > { %p771_p6 = scmp.ge.s32.totalorder %s993_s14, 1  ;;  %p83_p7 = scmp.eq.s32.totalorder %s80_s20, 0 }
   0xb   : > { %p1062_p8 = por %p102_p5, %p101_p3  ;;  %p137_p9 = scmp.lt.s32.totalorder %s993_s14, 3 }
   0xc   : > { %s1068_s22 = scalar_select %p83_p7, %s981_s11, %s85_s18  }
   0xd   : > { %p138_p10 = pnand %p771_p6, %p137_p9 }
   0xe   : > { %s773_s23 = sshll.u32 (!%p138_p10), %s985_s12, 2  ;;  %s160_s8 = sand.u32 (!%p138_p10), 1, %s977_s10  }
   0xf   : > { %141 = sbr.rel (%p138_p10) target bundleno = 270 (0x10e), region = 28  ;;  %p165_p11 = scmp.lt.s32.totalorder (!%p138_p10), %s773_s23, 7 }
  0x10   : > { %s772_s15 = sshll.u32 (!%p138_p10), %s160_s8, 8  ;;  %s857_s18 = sshll.u32 (!%p138_p10), %s985_s12, 12 }
  0x11   : > { %s1134_s16 = scalar_lea.vmem (!%p138_p10), [#allocation2], %s772_s15  ;;  %s1169_s25 = scalar_lea.hbm (!%p138_p10), %s1226_s2, %s857_s18 }
  0x12   : > { %s691_s20 = sshll.u32 (!%p138_p10), %s1134_s16, 4  ;;  %s1179_s12 = scalar_lea.sflag (!%p138_p10), [#allocation3], %s160_s8  ;;  %s1171_s20 = int_to_ptr.vmem [resolvable:$true] %s691_s20 }
  0x13   : > { %s917_s26 = scalar_lea.vmem (!%p138_p10), %s1171_s20, 4096 }
  0x14   : > { %v180_v0 = vlaneseq  ;;  %v995_v1 = vmov 0.0   ;;  %s1237_s23 = smov (!%p165_p11, %s773_s23), 7  ;;  %v996_v18 = vmov 1.0   ;;  %v176_v19 = vld [vmem:[%s1225_s1] sm:$0xff]  ;;  %vm204_vm8 = vcmask 130048   ;;  %v177_v20 = vld [vmem:[%s1225_s1 + $0x8] sm:$0xff]  ;;  %p918_p12 = scmp.ne.s32.totalorder %s1171_s20, %s917_s26 }
  0x15   : > { %281 = vmatprep.mubr.f32.mxu0 %v995_v1  ;;  %400 = vmatprep.mubr.f32.mxu1 %v995_v1  ;;  %s774_s24 = sshll.u32 %s1237_s23, 1  ;;  %v178_v21 = vld [vmem:[%s1225_s1 + $0x10] sm:$0xff]  ;;  %v179_v22 = vld [vmem:[%s1225_s1 + $0x18] sm:$0xff] }
  0x16   : > { %v1073_v2 = vshrl.u32 %v180_v0, 7  ;;  %s171_s27 = scalar_lea.vmem %s1224_s0, %s774_s24  ;;  %p919_p13 = pnand %p918_p12, %p1055_p4 }
  0x17   : > { %v183_v6 = vld [vmem:[%s171_s27] sm:$0x3]  ;;  %v787_v7 = vld [vmem:[%s171_s27 + $0x2] sm:$0x3]  ;;  %v808_v8 = vld [vmem:[%s171_s27 + $0x4] sm:$0x3] }
  0x18   : > { %v190_v3 = vsub.s32 1, %v1073_v2  ;;  %v186_v4 = vsub.s32 0, %v1073_v2  ;;  %v182_v5 = vadd.s32 8, %v1073_v2  ;;  %v829_v13 = vld [vmem:[%s171_s27 + $0x6] sm:$0x3]  ;;  %p920_p0 = pneg %p919_p13  ;;  %s997_s27 = smov [#allocation2]  }
  0x19   : > { %s921_s28 = sshll.u32 %s997_s27, 4  ;;  %s922_s28 = int_to_ptr.vmem [resolvable:$false] %s921_s28 }
  0x1a   : > { %v191_v9 = vrot.slane %v183_v6, %v190_v3  ;;  %v323_v10 = vrot.slane %v787_v7, %v190_v3  ;;  %v187_v11 = vrot.slane %v183_v6, %v186_v4  ;;  %v319_v12 = vrot.slane %v787_v7, %v186_v4  ;;  %s923_s29 = scalar_lea.vmem %s922_s28, 8192  ;;  %p924_p1 = scmp.lt.s32.totalorder %s1171_s20, %s922_s28 }
  0x1b   : > { %v439_v14 = vrot.slane %v808_v8, %v186_v4  ;;  %v443_v15 = vrot.slane %v808_v8, %v190_v3  ;;  %v559_v16 = vrot.slane %v829_v13, %v186_v4  ;;  %v563_v17 = vrot.slane %v829_v13, %v190_v3  ;;  %p925_p2 = scmp.lt.s32.totalorder %s923_s29, %s917_s26 }
  0x1c   : > { %vm195_vm0 = vcmp.eq.s32.totalorder %v182_v5, %v191_v9  ;;  %vm327_vm1 = vcmp.eq.s32.totalorder %v182_v5, %v323_v10  ;;  %vm194_vm2 = vcmp.eq.s32.totalorder %v182_v5, %v187_v11  ;;  %vm326_vm3 = vcmp.eq.s32.totalorder %v182_v5, %v319_v12 }
  0x1d   : > { %779 = vmatprep.subr.msk.mxu0 %vm195_vm0, %v996_v18  ;;  %792 = vmatprep.subr.msk.mxu1 %vm327_vm1, %v996_v18  ;;  %vm193_vm4 = vcmp.eq.s32.totalorder %v1073_v2, %v191_v9  ;;  %vm325_vm5 = vcmp.eq.s32.totalorder %v1073_v2, %v323_v10  ;;  %vm192_vm6 = vcmp.eq.s32.totalorder %v1073_v2, %v187_v11  ;;  %p926_p3 = por %p925_p2, %p924_p1 }
  0x1e   : > { %780 = vmatpush1.msk.msra.mxu0 %vm194_vm2, %v996_v18  ;;  %793 = vmatpush1.msk.msra.mxu1 %vm326_vm3, %v996_v18  ;;  %vm324_vm7 = vcmp.eq.s32.totalorder %v1073_v2, %v319_v12  ;;  %vm447_vm9 = vcmp.eq.s32.totalorder %v182_v5, %v443_v15  ;;  %vm567_vm10 = vcmp.eq.s32.totalorder %v182_v5, %v563_v17 }
  0x1f   : > { %781 = vmatprep.subr.msk.mxu0 %vm193_vm4, %v996_v18  ;;  %794 = vmatprep.subr.msk.mxu1 %vm325_vm5, %v996_v18  ;;  %vm446_vm11 = vcmp.eq.s32.totalorder %v182_v5, %v439_v14  ;;  %vm566_vm12 = vcmp.eq.s32.totalorder %v182_v5, %v559_v16  ;;  %vm445_vm13 = vcmp.eq.s32.totalorder %v1073_v2, %v443_v15  ;;  %p927_p5 = pnand %p926_p3, %p920_p0 }
  0x20   : > { %782 = vmatpush1.msk.msra.mxu0 %vm192_vm6, %v996_v18  ;;  %795 = vmatpush1.msk.msra.mxu1 %vm324_vm7, %v996_v18  ;;  %vm565_vm14 = vcmp.eq.s32.totalorder %v1073_v2, %v563_v17  ;;  %vm444_vm15 = vcmp.eq.s32.totalorder %v1073_v2, %v439_v14  ;;  %vm564_vm0 = vcmp.eq.s32.totalorder %v1073_v2, %v559_v16 }
  0x21   : > { %783 = vmatmul.mubr.msk.f32.vlgmr.msra.gmra.mxu0 %vm204_vm8, %v176_v19  ;;  %796 = vmatmul.mubr.msk.f32.vlgmr.msra.gmra.mxu1 %vm204_vm8, %v176_v19 }
  0x22   : > { %813 = vmatprep.subr.msk.mxu0 %vm447_vm9, %v996_v18  ;;  %834 = vmatprep.subr.msk.mxu1 %vm567_vm10, %v996_v18 }
  0x23   : > { %814 = vmatpush1.msk.msra.mxu0 %vm446_vm11, %v996_v18  ;;  %835 = vmatpush1.msk.msra.mxu1 %vm566_vm12, %v996_v18 }
  0x24   : > { %287 = vmatprep.mubr.f32.mxu0 %v995_v1  ;;  %406 = vmatprep.mubr.f32.mxu1 %v995_v1 }
  0x25   : > { %784 = vmatmul.mubr.msk.f32.gmra.mxu0 %vm204_vm8, %v177_v20  ;;  %797 = vmatmul.mubr.msk.f32.gmra.mxu1 %vm204_vm8, %v177_v20 }
  0x26   : > { %293 = vmatprep.mubr.f32.mxu0 %v995_v1  ;;  %412 = vmatprep.mubr.f32.mxu1 %v995_v1 }
  0x27   : > { %815 = vmatprep.subr.msk.mxu0 %vm445_vm13, %v996_v18  ;;  %836 = vmatprep.subr.msk.mxu1 %vm565_vm14, %v996_v18 }
  0x28   : > { %816 = vmatpush1.msk.msra.mxu0 %vm444_vm15, %v996_v18  ;;  %837 = vmatpush1.msk.msra.mxu1 %vm564_vm0, %v996_v18 }
  0x29   : > { %785 = vmatmul.mubr.msk.f32.gmra.mxu0 %vm204_vm8, %v178_v21  ;;  %798 = vmatmul.mubr.msk.f32.gmra.mxu1 %vm204_vm8, %v178_v21 }
  0x2a   : > { %299 = vmatprep.mubr.f32.mxu0 %v995_v1  ;;  %418 = vmatprep.mubr.f32.mxu1 %v995_v1 }
  0x2d   : > { %786 = vmatmul.mubr.msk.f32.gmra.mxu0 %vm204_vm8, %v179_v22  ;;  %799 = vmatmul.mubr.msk.f32.gmra.mxu1 %vm204_vm8, %v179_v22 }
  0x2e   : > { %520 = vmatprep.mubr.f32.mxu0 %v995_v1  ;;  %640 = vmatprep.mubr.f32.mxu1 %v995_v1 }
  0x31   : > { %817 = vmatmul.mubr.msk.f32.vlgmr.msra.gmra.mxu0 %vm204_vm8, %v176_v19  ;;  %838 = vmatmul.mubr.msk.f32.vlgmr.msra.gmra.mxu1 %vm204_vm8, %v176_v19 }
  0x32   : > { %526 = vmatprep.mubr.f32.mxu0 %v995_v1  ;;  %646 = vmatprep.mubr.f32.mxu1 %v995_v1 }
  0x35   : > { %818 = vmatmul.mubr.msk.f32.gmra.mxu0 %vm204_vm8, %v177_v20  ;;  %839 = vmatmul.mubr.msk.f32.gmra.mxu1 %vm204_vm8, %v177_v20 }
  0x36   : > { %532 = vmatprep.mubr.f32.mxu0 %v995_v1  ;;  %652 = vmatprep.mubr.f32.mxu1 %v995_v1 }
  0x39   : > { %819 = vmatmul.mubr.msk.f32.gmra.mxu0 %vm204_vm8, %v178_v21  ;;  %840 = vmatmul.mubr.msk.f32.gmra.mxu1 %vm204_vm8, %v178_v21 }
  0x3a   : > { %538 = vmatprep.mubr.f32.mxu0 %v995_v1  ;;  %658 = vmatprep.mubr.f32.mxu1 %v995_v1 }
  0x3d   : > { %820 = vmatmul.mubr.msk.f32.gmra.mxu0 %vm204_vm8, %v179_v22  ;;  %841 = vmatmul.mubr.msk.f32.gmra.mxu1 %vm204_vm8, %v179_v22 }
  0xe1   : > { %v283_v23 = vpop.f32.mrf.mxu0  ;;  %v402_v24 = vpop.f32.mrf.mxu1 }
  0xe2   : > { %306 = vst [vmem:[%s1134_s16] sm:$0xff] %v283_v23  ;;  %800 = vst [vmem:[%s1134_s16 + $0x40] sm:$0xff] %v402_v24 }
  0xe3   : > { %v285_v25 = vpop.f32.mrf.mxu0  ;;  %v404_v26 = vpop.f32.mrf.mxu1 }
  0xe4   : > { %307 = vst [vmem:[%s1134_s16 + $0x8] sm:$0xff] %v285_v25  ;;  %801 = vst [vmem:[%s1134_s16 + $0x48] sm:$0xff] %v404_v26 }
  0xe5   : > { %v289_v27 = vpop.f32.mrf.mxu0  ;;  %v408_v28 = vpop.f32.mrf.mxu1 }
  0xe6   : > { %308 = vst [vmem:[%s1134_s16 + $0x10] sm:$0xff] %v289_v27  ;;  %802 = vst [vmem:[%s1134_s16 + $0x50] sm:$0xff] %v408_v28 }
  0xe7   : > { %v291_v29 = vpop.f32.mrf.mxu0  ;;  %v410_v30 = vpop.f32.mrf.mxu1 }
  0xe8   : > { %309 = vst [vmem:[%s1134_s16 + $0x18] sm:$0xff] %v291_v29  ;;  %803 = vst [vmem:[%s1134_s16 + $0x58] sm:$0xff] %v410_v30 }
  0xe9   : > { %v295_v31 = vpop.f32.mrf.mxu0  ;;  %v414_v32 = vpop.f32.mrf.mxu1 }
  0xea   : > { %310 = vst [vmem:[%s1134_s16 + $0x20] sm:$0xff] %v295_v31  ;;  %804 = vst [vmem:[%s1134_s16 + $0x60] sm:$0xff] %v414_v32 }
  0xeb   : > { %v297_v33 = vpop.f32.mrf.mxu0  ;;  %v416_v34 = vpop.f32.mrf.mxu1 }
  0xec   : > { %311 = vst [vmem:[%s1134_s16 + $0x28] sm:$0xff] %v297_v33  ;;  %805 = vst [vmem:[%s1134_s16 + $0x68] sm:$0xff] %v416_v34 }
  0xed   : > { %v301_v35 = vpop.f32.mrf.mxu0  ;;  %v420_v36 = vpop.f32.mrf.mxu1 }
  0xee   : > { %312 = vst [vmem:[%s1134_s16 + $0x30] sm:$0xff] %v301_v35  ;;  %806 = vst [vmem:[%s1134_s16 + $0x70] sm:$0xff] %v420_v36 }
  0xef   : > { %v303_v37 = vpop.f32.mrf.mxu0  ;;  %v422_v38 = vpop.f32.mrf.mxu1 }
  0xf0   : > { %313 = vst [vmem:[%s1134_s16 + $0x38] sm:$0xff] %v303_v37  ;;  %807 = vst [vmem:[%s1134_s16 + $0x78] sm:$0xff] %v422_v38 }
  0xf1   : > { %v522_v39 = vpop.f32.mrf.mxu0  ;;  %v642_v40 = vpop.f32.mrf.mxu1 }
  0xf2   : > { %821 = vst [vmem:[%s1134_s16 + $0x80] sm:$0xff] %v522_v39  ;;  %842 = vst [vmem:[%s1134_s16 + $0xc0] sm:$0xff] %v642_v40 }
  0xf3   : > { %v524_v41 = vpop.f32.mrf.mxu0  ;;  %v644_v42 = vpop.f32.mrf.mxu1 }
  0xf4   : > { %822 = vst [vmem:[%s1134_s16 + $0x88] sm:$0xff] %v524_v41  ;;  %843 = vst [vmem:[%s1134_s16 + $0xc8] sm:$0xff] %v644_v42 }
  0xf5   : > { %v528_v43 = vpop.f32.mrf.mxu0  ;;  %v648_v44 = vpop.f32.mrf.mxu1 }
  0xf6   : > { %823 = vst [vmem:[%s1134_s16 + $0x90] sm:$0xff] %v528_v43  ;;  %844 = vst [vmem:[%s1134_s16 + $0xd0] sm:$0xff] %v648_v44 }
  0xf7   : > { %v530_v45 = vpop.f32.mrf.mxu0  ;;  %v650_v46 = vpop.f32.mrf.mxu1 }
  0xf8   : > { %824 = vst [vmem:[%s1134_s16 + $0x98] sm:$0xff] %v530_v45  ;;  %845 = vst [vmem:[%s1134_s16 + $0xd8] sm:$0xff] %v650_v46 }
  0xf9   : > { %v534_v47 = vpop.f32.mrf.mxu0  ;;  %v654_v48 = vpop.f32.mrf.mxu1 }
  0xfa   : > { %825 = vst [vmem:[%s1134_s16 + $0xa0] sm:$0xff] %v534_v47  ;;  %846 = vst [vmem:[%s1134_s16 + $0xe0] sm:$0xff] %v654_v48 }
  0xfb   : > { %v536_v49 = vpop.f32.mrf.mxu0  ;;  %v656_v50 = vpop.f32.mrf.mxu1 }
  0xfc   : > { %826 = vst [vmem:[%s1134_s16 + $0xa8] sm:$0xff] %v536_v49  ;;  %847 = vst [vmem:[%s1134_s16 + $0xe8] sm:$0xff] %v656_v50 }
  0xfd   : > { %v540_v51 = vpop.f32.mrf.mxu0  ;;  %v660_v52 = vpop.f32.mrf.mxu1 }
  0xfe   : > { %827 = vst [vmem:[%s1134_s16 + $0xb0] sm:$0xff] %v540_v51  ;;  %848 = vst [vmem:[%s1134_s16 + $0xf0] sm:$0xff] %v660_v52 }
  0xff   : > { %v542_v53 = vpop.f32.mrf.mxu0  ;;  %v662_v54 = vpop.f32.mrf.mxu1 }
 0x100   : > { %828 = vst [vmem:[%s1134_s16 + $0xb8] sm:$0xff] %v542_v53  ;;  %849 = vst [vmem:[%s1134_s16 + $0xf8] sm:$0xff] %v662_v54 }
 0x101   : > { %930 = shalt.err (!%p927_p5)
}
 0x102   : > { %s931_s30 = scalar_lea.hbm %s1169_s25, 4096  ;;  %s935_s5 = scalar_lea.hbm %s1226_s2, 8192 }
 0x103   : > { %p932_p6 = scmp.ne.s32.totalorder %s1169_s25, %s931_s30  ;;  %p936_p10 = scmp.lt.s32.totalorder %s1169_s25, %s1226_s2 }
 0x104   : > { %p937_p11 = scmp.lt.s32.totalorder %s935_s5, %s931_s30 }
 0x105   : > { %p933_p7 = pnand %p932_p6, %p1055_p4 }
 0x106   : > { %p938_p12 = por %p937_p11, %p936_p10 }
 0x107   : > { %p934_p9 = pneg %p933_p7 }
 0x109   : > { %p939_p13 = pnand %p938_p12, %p934_p9 }
 0x10b   : > { %942 = shalt.err (!%p939_p13)
}
 0x10c   : > { %s998_s8 = smov 256   ;;  %s999_s15 = smov 16  }
 0x10d   : > { %858 = dma.vmem_to_hbm [thread:$0]  (%p1055_p4), %s1171_s20, 4096, %s1169_s25, %s1179_s12, %s998_s8, %s998_s8, %s999_s15  }
 0x10e PF: > { %p864_p0 = scmp.ge.s32.totalorder %s993_s14, 2  ;;  %s706_s16 = sand.u32 1, %s973_s9  }
 0x10f   : > { %s707_s18 = scalar_lea.sflag [#allocation3], %s706_s16 }
 0x110   : > { %p861_p1 = pnand %p864_p0, %p1062_p8 }
 0x112   : > { %p862_p2 = pneg %p861_p1 }
 0x114   : > { %968 = dma.done.wait (%p862_p2), %s707_s18, 4096  }
 0x115   : > { %970 = vsyncadd (%p862_p2), %s707_s18, 4294963200  ;;  %s15_s14 = sadd.s32 1, %s993_s14   ;;  %s1229_s9 = smov %s977_s10 }
 0x116   : > { %p12_p3 = scmp.ge.s32.totalorder %s15_s14, 4   ;;  %s1230_s10 = smov %s981_s11 }
 0x117   : > { %s1231_s11 = smov %s1068_s22  ;;  %s1232_s12 = smov %s989_s13 }
 0x118   : > { %s1233_s13 = smov %s1235_s17  ;;  %14 = sbr.rel (!%p12_p3) target bundleno = 4 (0x4), region = 69 }
 0x11d   :  { %712 = vsyncpa [#allocation3], 1 }
 0x11e   :  { %714 = vsyncpa [#allocation3 + $0x1], 1 }

</bundles_post_ra>
